<compile_context>
chip_gen: v7x
topology: tpu7x:2x2x1
jax: 0.10.0
libtpu: 0.0.40
codegen_flags: <defaults>
</compile_context>

<pallas_src>
import jax
import jax.numpy as jnp
from jax import lax
from jax.experimental import pallas as pl
from jax.experimental.pallas import tpu as pltpu


def _fr_classifier_kernel(pooled_ref, w_ref, o_ref):
    # pooled_ref: (B, C)   pooled features, C lane-dense, VMEM-resident across grid
    # w_ref:      (TN, C)  weight tile in native torch Linear layout (out, in)
    # o_ref:      (B, TN)  logits tile
    o_ref[...] = lax.dot_general(
        pooled_ref[...], w_ref[...],
        dimension_numbers=(((1,), (1,)), ((), ())),   # contract C with C (trans_b)
        preferred_element_type=jnp.float32,
    ).astype(o_ref.dtype)


def _pick_tn(numclass, itemsize):
    """Largest lane-dense N tile that divides numclass, capped per weight dtype."""
    max_tile = 2048 if itemsize <= 2 else 1024   # <= 8 MiB per weight block
    if numclass <= max_tile:
        # Small class counts: split in two lane-aligned halves when possible so
        # the 'parallel' N axis can feed both v7x TensorCores.
        if numclass >= 512 and numclass % 256 == 0:
            return numclass // 2
        return numclass
    for cand in (max_tile, 1536, 1024, 768, 512, 384, 256, 128):
        if cand <= max_tile and numclass % cand == 0:
            return cand
    return None  # ragged: caller falls back to padding


def fr_model_classifier(feature, weight, *, tn=None):
    """feature: (B, C, H, W) NCHW; weight: (numclass, C) as in torch Linear.

    Returns (B, numclass) = fc(adaptive_avg_pool(feature)), 'softmax' branch.
    """
    B, C, H, W = feature.shape
    numclass, C_w = weight.shape
    assert C == C_w, "weight in-features must match channel count"

    # Pool once in the wrapper: a plain XLA reduce over H,W (no transpose, no
    # extra HBM copy of the feature).  Accumulate in f32, then match the weight
    # dtype so bf16 weights are consumed natively by the MXU in the kernel.
    pooled = jnp.mean(feature.astype(jnp.float32), axis=(2, 3)).astype(weight.dtype)
    out_dtype = jnp.result_type(feature.dtype, weight.dtype)
    itemsize = jnp.dtype(weight.dtype).itemsize

    if tn is None:
        tn = _pick_tn(numclass, itemsize)

    n_total = numclass
    w_in = weight
    if tn is None or numclass % tn != 0:
        # Ragged fallback: pad the weight's N axis up to a tile multiple.
        # TODO(synk): for production, pad/retile the weight once at model-load
        # time instead of per call.
        if tn is None:
            tn = 2048 if itemsize <= 2 else 1024
        n_total = pl.cdiv(numclass, tn) * tn
        w_in = jnp.pad(weight, ((0, n_total - numclass), (0, 0)))

    grid_n = n_total // tn

    w_spec = pl.BlockSpec((tn, C), lambda n: (n, 0))
    if grid_n >= 3:
        # Pure DMA-bound pipeline: a third weight buffer keeps the DMA engine
        # back-to-back across grid-step boundaries.
        w_spec = pl.BlockSpec((tn, C), lambda n: (n, 0),
                              pipeline_mode=pl.Buffered(3))

    cost = pl.CostEstimate(
        flops=2 * B * C * numclass,
        transcendentals=0,
        bytes_accessed=(numclass * C * itemsize
                        + B * C * itemsize
                        + B * numclass * jnp.dtype(out_dtype).itemsize),
    )

    out = pl.pallas_call(
        _fr_classifier_kernel,
        out_shape=jax.ShapeDtypeStruct((B, n_total), out_dtype),
        grid_spec=pltpu.PrefetchScalarGridSpec(
            num_scalar_prefetch=0,
            grid=(grid_n,),
            in_specs=[
                # Constant index_map -> pooled block stays VMEM-resident
                # (fetched from HBM exactly once); it is tiny (B x 2048).
                pl.BlockSpec((B, C), lambda n: (0, 0)),
                # Weight streamed once, one lane-dense (on C) N-tile per step,
                # in its native (numclass, C) layout — no wrapper transpose.
                w_spec,
            ],
            out_specs=pl.BlockSpec((B, tn), lambda n: (0, n)),
        ),
        compiler_params=pltpu.CompilerParams(
            # N tiles are independent -> megacore split on v7x, no-op elsewhere.
            dimension_semantics=("parallel",),
            # Worst case ~3 x 8 MiB weight buffers + small pooled/output blocks:
            # above v5e's 16 MiB scoped default, safely under v7x's 64 MiB/TC.
            vmem_limit_bytes=48 * 1024 * 1024,
        ),
        cost_estimate=cost,
    )(pooled, w_in)

    return out[:, :numclass] if n_total != numclass else out


if __name__ == "__main__":
    # The module fixes in-features at 2048 (fc = Linear(2048, numclass, bias=False)),
    # so channels must be 2048; keep batch/spatial/numclass small.
    B, C, H, W = 2, 2048, 4, 4
    NUMCLASS = 16

    key = jax.random.PRNGKey(0)
    k_feat, k_w = jax.random.split(key)
    feature = jax.random.normal(k_feat, (B, C, H, W), dtype=jnp.float32)
    # Synthetic weight for nn.Linear(2048, NUMCLASS, bias=False): shape (NUMCLASS, 2048).
    weight = jax.random.normal(k_w, (NUMCLASS, C), dtype=jnp.float32) * 0.02

    # Pure-JAX reference of the 'softmax' branch of the PyTorch forward.
    pooled_ref = jnp.mean(feature.reshape(B, C, H * W), axis=-1)   # (B, C)
    y_ref = pooled_ref @ weight.T                                  # (B, NUMCLASS)

    # 1) Toy class count: single full-extent N tile.
    y = jax.block_until_ready(fr_model_classifier(feature, weight))
    assert y.shape == (B, NUMCLASS)
    assert jnp.allclose(y, y_ref, atol=1e-4, rtol=1e-4), "mismatch vs reference (single tile)"

    # 2) Larger class count: auto tn splits N into >= 2 lane-dense tiles
    #    (exercises the parallel/tiled weight-streaming path).
    NUMCLASS2 = 512
    weight2 = jax.random.normal(k_w, (NUMCLASS2, C), dtype=jnp.float32) * 0.02
    y2 = jax.block_until_ready(fr_model_classifier(feature, weight2))
    y2_ref = pooled_ref @ weight2.T
    assert y2.shape == (B, NUMCLASS2)
    assert jnp.allclose(y2, y2_ref, atol=1e-4, rtol=1e-4), "mismatch vs reference (tiled N)"

    # TODO(synk): the non-'softmax' branch's `W = F.normalize(W, ...)` in the original
    # PyTorch code is a no-op on the parameter (rebinds a loop variable); only the
    # default 'softmax' branch is implemented here.
    print("KERNEL_OK")
</pallas_src>

<mosaic_0001>
module attributes {stable_mosaic.version = 11 : i64} {
  func.func @_fr_classifier_kernel(%arg0: i32, %arg1: memref<2x2048xf32, #tpu.memory_space<vmem>>, %arg2: memref<16x2048xf32, #tpu.memory_space<vmem>>, %arg3: memref<2x16xf32, #tpu.memory_space<vmem>>) attributes {dimension_semantics = [#tpu.dimension_semantics<parallel>], iteration_bounds = array<i64: 1>, scalar_prefetch = 0 : i64, scratch_operands = 0 : i64, tpu.core_type = #tpu.core_type<tc>, window_params = [{pipeline_mode = #tpu.pipeline_mode<synchronous>, transform_indices = @transform_0, window_bounds = array<i64: 2, 2048>}, {transform_indices = @transform_1, window_bounds = array<i64: 16, 2048>}, {transform_indices = @transform_2, window_bounds = array<i64: 2, 16>}]} {
    %c0 = arith.constant 0 : index
    %c0_0 = arith.constant 0 : index
    %0 = vector.load %arg1[%c0, %c0_0] : memref<2x2048xf32, #tpu.memory_space<vmem>>, vector<2x2048xf32>
    %c0_1 = arith.constant 0 : index
    %c0_2 = arith.constant 0 : index
    %1 = vector.load %arg2[%c0_1, %c0_2] : memref<16x2048xf32, #tpu.memory_space<vmem>>, vector<16x2048xf32>
    %cst = arith.constant dense<0.000000e+00> : vector<2x16xf32>
    %2 = tpu.matmul %0, %1, %cst {dimension_numbers = #tpu.dot_dimension_numbers<[1], [1], [0], [0], [0, 0, 1, 0], [], []>} : vector<2x2048xf32>, vector<16x2048xf32>, vector<2x16xf32> -> vector<2x16xf32>
    %c0_3 = arith.constant 0 : index
    %c0_4 = arith.constant 0 : index
    %3 = vector.load %arg3[%c0_3, %c0_4] : memref<2x16xf32, #tpu.memory_space<vmem>>, vector<2x16xf32>
    tpu.vector_store %arg3[%c0_3, %c0_4], %2 {strides = array<i32>} : memref<2x16xf32, #tpu.memory_space<vmem>>, vector<2x16xf32>,
    return
  }
  func.func @transform_0(%arg0: i32) -> (i32, i32) {
    %c0_i32 = arith.constant 0 : i32
    %c0_i32_0 = arith.constant 0 : i32
    %c0_i32_1 = arith.constant 0 : i32
    return %c0_i32, %c0_i32_0 : i32, i32
  }
  func.func @transform_1(%arg0: i32) -> (i32, i32) {
    %c0_i32 = arith.constant 0 : i32
    %c0_i32_0 = arith.constant 0 : i32
    return %arg0, %c0_i32 : i32, i32
  }
  func.func @transform_2(%arg0: i32) -> (i32, i32) {
    %c0_i32 = arith.constant 0 : i32
    %c0_i32_0 = arith.constant 0 : i32
    return %c0_i32, %arg0 : i32, i32
  }
}

</mosaic_0001>

<bundles_post_ra>
// kernel: tpu_custom_call.1
= control target key start
LH: loop header
LB: loop body
LE: loop exit
PB: predicated region body
PF: predicated region fallthrough
CT: control target
= control target key end

     0   :  { %7 = vsyncpa [#allocation3], 0  ;;  %s941_s0 = inlined_call_operand.hbm [shape: f32[2,2048], index: 0, kind: input, shape index: {}]   ;;  %s942_s1 = inlined_call_operand.hbm [shape: f32[16,2048], index: 1, kind: input, shape index: {}]   ;;  %s943_s2 = inlined_call_operand.hbm [shape: f32[2,16], index: 2, kind: output, shape index: {}]  }
   0x1   :  { %8 = vsyncpa [#allocation6], 0 }
   0x2   :  { %9 = vsyncpa [#allocation4], 0  ;;  %s867_s9 = smov [#allocation2]   ;;  %s868_s11 = smov [#allocation5]  }
   0x3   :  { %s16_s10 = sshll.u32 %s867_s9, 4  ;;  %s25_s12 = sshll.u32 %s868_s11, 4  ;;  %s17_s10 = int_to_ptr.vmem [resolvable:$true] %s16_s10  ;;  %s888_s12 = int_to_ptr.vmem [resolvable:$true] %s25_s12 }
   0x4   :  { %s795_s15 = scalar_lea.hbm %s941_s0, 512 }
   0x5   :  { %p796_p0 = scmp.ne.s32.totalorder %s941_s0, %s795_s15  ;;  %p799_p1 = scmp.lt.u32.totalorder %s795_s15, %s941_s0 }
   0x7   :  { %p801_p2 = pnand %p799_p1, %p796_p0 }
   0x9   :  { %804 = shalt.err (!%p801_p2)
}
   0xa   :  { %s805_s20 = scalar_lea.vmem %s17_s10, 512  ;;  %p810_p4 = scmp.lt.s32.totalorder %s17_s10, %s17_s10 }
   0xb   :  { %p806_p3 = scmp.ne.s32.totalorder %s17_s10, %s805_s20  ;;  %p811_p5 = scmp.lt.s32.totalorder %s805_s20, %s805_s20 }
   0xd   :  { %p812_p6 = por %p811_p5, %p810_p4 }
   0xf   :  { %p813_p7 = pnand %p812_p6, %p806_p3 }
  0x11   :  { %816 = shalt.err (!%p813_p7)
}
  0x12   :  { %19 = dma.hbm_to_vmem [thread:$0]  %s941_s0, 512, %s17_s10, [#allocation3]  }
  0x13   :  { %s817_s25 = scalar_lea.hbm %s942_s1, 4096 }
  0x14   :  { %p818_p8 = scmp.ne.s32.totalorder %s942_s1, %s817_s25  ;;  %p821_p9 = scmp.lt.u32.totalorder %s817_s25, %s942_s1 }
  0x16   :  { %p823_p10 = pnand %p821_p9, %p818_p8 }
  0x18   :  { %826 = shalt.err (!%p823_p10)
}
  0x19   :  { %s827_s30 = scalar_lea.vmem %s888_s12, 4096  ;;  %p832_p12 = scmp.lt.s32.totalorder %s888_s12, %s888_s12 }
  0x1a   :  { %p828_p11 = scmp.ne.s32.totalorder %s888_s12, %s827_s30  ;;  %p833_p13 = scmp.lt.s32.totalorder %s827_s30, %s827_s30 }
  0x1c   :  { %p834_p0 = por %p833_p13, %p832_p12 }
  0x1e   :  { %p835_p1 = pnand %p834_p0, %p828_p11 }
  0x20   :  { %838 = shalt.err (!%p835_p1)
}
  0x21   :  { %s869_s0 = smov 2048   ;;  %s870_s3 = smov 128  }
  0x22   :  { %31 = dma.hbm_to_vmem [thread:$0]  %s942_s1, 4096, %s888_s12, [#allocation6], %s869_s0, %s869_s0, %s870_s3  }
  0x23   :  { %861 = dma.done.wait [#allocation3], 512  }
  0x24   :  { %862 = vsyncadd [#allocation3], 4294966784 }
  0x25   :  { %863 = dma.done.wait [#allocation6], 4096  }
  0x26   :  { %864 = vsyncadd [#allocation6], 4294963200  ;;  %v82_v0 = vlaneseq  ;;  %v871_v1 = vmov 1983009808   ;;  %v43_v6 = vld [vmem:[#allocation5 + $0x8] sm:$0xff]  ;;  %v42_v11 = vld [vmem:[#allocation5] sm:$0xff] }
  0x27   :  { %v80_v2 = vunpack.c.l.s4 %v871_v1  ;;  %v59_v7 = vld [vmem:[#allocation5 + $0x88] sm:$0xff]  ;;  %v58_v12 = vld [vmem:[#allocation5 + $0x80] sm:$0xff]  ;;  %v40_v21 = vld [vmem:[#allocation2 + $0x10] sm:$0xff]  ;;  %s872_s1 = smov [#allocation7]   ;;  %vm722_vm0 = vcmask 123904  }
  0x28   :  { %v83_v3 = vshrl.u32 %v82_v0, 7  ;;  %v51_v8 = vld [vmem:[#allocation5 + $0x48] sm:$0xff]  ;;  %v740_v9 = vpack.c.bf16 %v59_v7, %v43_v6  ;;  %v742_v14 = vpack.c.bf16 %v58_v12, %v42_v11  ;;  %v50_v15 = vld [vmem:[#allocation5 + $0x40] sm:$0xff]  ;;  %v45_v22 = vld [vmem:[#allocation5 + $0x18] sm:$0xff]  ;;  %v112_v24 = vcombine.high %v40_v21, %v40_v21  ;;  %s730_s6 = sshll.u32 %s872_s1, 4  ;;  %s731_s6 = int_to_ptr.vmem [resolvable:$true] %s730_s6 }
  0x29   :  { %v81_v4 = vunpack.c.0.s8 %v80_v2  ;;  %v67_v10 = vld [vmem:[#allocation5 + $0xc8] sm:$0xff]  ;;  %v66_v16 = vld [vmem:[#allocation5 + $0xc0] sm:$0xff]  ;;  %v61_v23 = vld [vmem:[#allocation5 + $0x98] sm:$0xff]  ;;  %s839_s7 = scalar_lea.vmem %s731_s6, 32  ;;  %p844_p3 = scmp.lt.s32.totalorder %s731_s6, %s731_s6 }
  0x2a   :  { %v756_v13 = vpack.c.bf16 %v67_v10, %v51_v8  ;;  %v38_v17 = vld [vmem:[#allocation2] sm:$0xff]  ;;  %741 = vmatprep.subr.bf16.mxu1 %v740_v9  ;;  %v758_v18 = vpack.c.bf16 %v66_v16, %v50_v15  ;;  %v744_v26 = vpack.c.bf16 %v61_v23, %v45_v22  ;;  %v53_v27 = vld [vmem:[#allocation5 + $0x58] sm:$0xff]  ;;  %v44_v31 = vld [vmem:[#allocation5 + $0x10] sm:$0xff]  ;;  %p840_p2 = scmp.ne.s32.totalorder %s731_s6, %s839_s7  ;;  %p845_p4 = scmp.lt.s32.totalorder %s839_s7, %s839_s7 }
  0x2b   :  { %v919_v5 = vsub.s32 %v81_v4, %v83_v3  ;;  %v78_v19 = vcombine.high %v38_v17, %v38_v17  ;;  %743 = vmatpush1.bf16.xpose.msra.mxu1 %v742_v14  ;;  %v69_v28 = vld [vmem:[#allocation5 + $0xd8] sm:$0xff]  ;;  %v60_v32 = vld [vmem:[#allocation5 + $0x90] sm:$0xff]  ;;  %v47_v38 = vld [vmem:[#allocation5 + $0x28] sm:$0xff] }
  0x2c   :  { %757 = vmatprep.subr.bf16.mxu0 %v756_v13  ;;  %v760_v30 = vpack.c.bf16 %v69_v28, %v53_v27  ;;  %745 = vmatprep.subr.bf16.mxu1 %v744_v26  ;;  %v52_v35 = vld [vmem:[#allocation5 + $0x50] sm:$0xff]  ;;  %v63_v39 = vld [vmem:[#allocation5 + $0xa8] sm:$0xff]  ;;  %v746_v40 = vpack.c.bf16 %v60_v32, %v44_v31  ;;  %v41_v49 = vld [vmem:[#allocation2 + $0x18] sm:$0xff]  ;;  %p846_p5 = por %p845_p4, %p844_p3 }
  0x2d   :  { %v85_v20 = vrot.slane %v38_v17, %v919_v5  ;;  %v119_v25 = vrot.slane %v40_v21, %v919_v5  ;;  %759 = vmatpush1.bf16.xpose.msra.mxu0 %v758_v18  ;;  %v92_v33 = vrot.slane %v78_v19, %v919_v5  ;;  %v68_v36 = vld [vmem:[#allocation5 + $0xd0] sm:$0xff]  ;;  %v126_v37 = vrot.slane %v112_v24, %v919_v5  ;;  %v55_v41 = vld [vmem:[#allocation5 + $0x68] sm:$0xff]  ;;  %v46_v50 = vld [vmem:[#allocation5 + $0x20] sm:$0xff] }
  0x2e   :  { %761 = vmatprep.subr.bf16.mxu0 %v760_v30  ;;  %v71_v42 = vld [vmem:[#allocation5 + $0xe8] sm:$0xff]  ;;  %v762_v43 = vpack.c.bf16 %v68_v36, %v52_v35  ;;  %v748_v46 = vpack.c.bf16 %v63_v39, %v47_v38  ;;  %v62_v51 = vld [vmem:[#allocation5 + $0xa0] sm:$0xff]  ;;  %v136_v55 = vrot.slane %v41_v49, %v919_v5  ;;  %v49_v56 = vld [vmem:[#allocation5 + $0x38] sm:$0xff]  ;;  %v129_v2 = vcombine.high %v41_v49, %v41_v49  ;;  %p847_p6 = pnand %p846_p5, %p840_p2 }
  0x2f   :  { %v93_v29 = vcombine.high %v85_v20, %v85_v20  ;;  %v127_v34 = vcombine.high %v119_v25, %v119_v25  ;;  %v94_v44 = vcombine.high %v92_v33, %v92_v33  ;;  %v128_v45 = vcombine.high %v126_v37, %v126_v37  ;;  %v39_v47 = vld [vmem:[#allocation2 + $0x8] sm:$0xff]  ;;  %v54_v53 = vld [vmem:[#allocation5 + $0x60] sm:$0xff]  ;;  %v65_v57 = vld [vmem:[#allocation5 + $0xb8] sm:$0xff] }
  0x30   :  { %v764_v48 = vpack.c.bf16 %v71_v42, %v55_v41  ;;  %v102_v52 = vrot.slane %v39_v47, %v919_v5  ;;  %v70_v54 = vld [vmem:[#allocation5 + $0xe0] sm:$0xff]  ;;  %v750_v58 = vpack.c.bf16 %v62_v51, %v46_v50  ;;  %v57_v59 = vld [vmem:[#allocation5 + $0x78] sm:$0xff]  ;;  %v95_v63 = vcombine.high %v39_v47, %v39_v47  ;;  %v48_v4 = vld [vmem:[#allocation5 + $0x30] sm:$0xff] }
  0x31   :  { %226 = vmatprep.mubr.f32.mxu1 %v93_v29  ;;  %506 = vmatprep.mubr.f32.mxu0 %v127_v34  ;;  %v73_v60 = vld [vmem:[#allocation5 + $0xf8] sm:$0xff]  ;;  %v766_v61 = vpack.c.bf16 %v70_v54, %v54_v53  ;;  %v144_v0 = vcombine.high %v136_v55, %v136_v55  ;;  %v752_v1 = vpack.c.bf16 %v65_v57, %v49_v56  ;;  %v64_v6 = vld [vmem:[#allocation5 + $0xb0] sm:$0xff] }
  0x32   :  { %227 = vmatmul.mubr.f32.vlgmr.msra.gmra.mrb[0].mxu1 %v85_v20  ;;  %v110_v62 = vcombine.high %v102_v52, %v102_v52  ;;  %v768_v3 = vpack.c.bf16 %v73_v60, %v57_v59  ;;  %v109_v7 = vrot.slane %v95_v63, %v919_v5  ;;  %v56_v8 = vld [vmem:[#allocation5 + $0x70] sm:$0xff]  ;;  %v143_v10 = vrot.slane %v129_v2, %v919_v5 }
  0x33   :  { %747 = vmatpush1.bf16.xpose.msra.mxu1 %v746_v40  ;;  %296 = vmatprep.mubr.f32.mxu1 %v94_v44  ;;  %v72_v9 = vld [vmem:[#allocation5 + $0xf0] sm:$0xff]  ;;  %v754_v11 = vpack.c.bf16 %v64_v6, %v48_v4 }
  0x34   :  { %507 = vmatmul.mubr.f32.vlgmr.msra.gmra.mrb[0].mxu0 %v119_v25  ;;  %749 = vmatprep.subr.bf16.mxu1 %v748_v46  ;;  %v770_v12 = vpack.c.bf16 %v72_v9, %v56_v8  ;;  %v111_v13 = vcombine.high %v109_v7, %v109_v7  ;;  %v145_v14 = vcombine.high %v143_v10, %v143_v10 }
  0x35   :  { %763 = vmatpush1.bf16.xpose.msra.mxu0 %v762_v43  ;;  %576 = vmatprep.mubr.f32.mxu0 %v128_v45 }
  0x36   :  { %765 = vmatprep.subr.bf16.mxu0 %v764_v48 }
  0x3a   :  { %297 = vmatmul.mubr.f32.vlgmr.msra.gmra.mrb[0].mxu1 %v92_v33 }
  0x3b   :  { %751 = vmatpush1.bf16.xpose.msra.mxu1 %v750_v58  ;;  %366 = vmatprep.mubr.f32.mxu1 %v110_v62 }
  0x3c   :  { %577 = vmatmul.mubr.f32.vlgmr.msra.gmra.mrb[0].mxu0 %v126_v37  ;;  %753 = vmatprep.subr.bf16.mxu1 %v752_v1 }
  0x3d   :  { %767 = vmatpush1.bf16.xpose.msra.mxu0 %v766_v61  ;;  %646 = vmatprep.mubr.f32.mxu0 %v144_v0 }
  0x3e   :  { %769 = vmatprep.subr.bf16.mxu0 %v768_v3 }
  0x42   :  { %367 = vmatmul.mubr.f32.vlgmr.msra.gmra.mrb[0].mxu1 %v102_v52 }
  0x43   :  { %755 = vmatpush1.bf16.xpose.msra.mxu1 %v754_v11  ;;  %436 = vmatprep.mubr.f32.mxu1 %v111_v13 }
  0x44   :  { %647 = vmatmul.mubr.f32.vlgmr.msra.gmra.mrb[0].mxu0 %v136_v55 }
  0x45   :  { %771 = vmatpush1.bf16.xpose.msra.mxu0 %v770_v12  ;;  %716 = vmatprep.mubr.f32.mxu0 %v145_v14 }
  0x4a   :  { %437 = vmatmul.mubr.f32.vlgmr.msra.gmra.mrb[0].mxu1 %v109_v7 }
  0x4c   :  { %717 = vmatmul.mubr.f32.vlgmr.msra.gmra.mrb[0].mxu0 %v143_v10 }
 0x11d   :  { %v438_v15 = vpop.f32.mrb[0].mxu1 }
 0x11e   :  { %v440_v17 = vpop.f32.mrb[1].mxu1 }
 0x11f   :  { %v718_v16 = vpop.f32.mrb[0].mxu0 }
 0x120   :  { %v772_v5 = vadd.f32 %v718_v16, %v438_v15  ;;  %v720_v18 = vpop.f32.mrb[1].mxu0 }
 0x122   :  { %723 = vst.msk [vmem:[#allocation7] sm:$0x3] %vm722_vm0, %v772_v5 }
 0x123   :  { %850 = shalt.err (!%p847_p6)
}
 0x124   :  { %s851_s10 = scalar_lea.hbm %s943_s2, 32 }
 0x125   :  { %p852_p7 = scmp.ne.s32.totalorder %s943_s2, %s851_s10  ;;  %p855_p8 = scmp.lt.u32.totalorder %s851_s10, %s943_s2 }
 0x127   :  { %p857_p9 = pnand %p855_p8, %p852_p7 }
 0x129   :  { %860 = shalt.err (!%p857_p9)
}
 0x12a   :  { %733 = dma.vmem_to_hbm [thread:$0]  %s731_s6, 32, %s943_s2, [#allocation4]  }
 0x12b   :  { %865 = dma.done.wait [#allocation4], 32  }
 0x12c   :  { %866 = vsyncadd [#allocation4], 4294967264 }
 0x12d   :  { %737 = vsyncpa [#allocation3], 1 }
 0x12e   :  { %738 = vsyncpa [#allocation6], 1 }
 0x12f   :  { %739 = vsyncpa [#allocation4], 1 }

</bundles_post_ra>
